<compile_context>
chip_gen: v6e
topology: v6e:2x2x1
jax: 0.10.0
libtpu: 0.0.40
codegen_flags: <defaults>
</compile_context>

<pallas_src>
import functools

import jax
import jax.numpy as jnp
from jax import lax
from jax.experimental import pallas as pl
from jax.experimental.pallas import tpu as pltpu

_MB = 1024 * 1024


def _mosaic_params(dimension_semantics, vmem_bytes):
    # Explicit scoped-VMEM budget (v7x: 64 MiB physical / 32 MiB default
    # scoped limit).  Never below the common 32 MiB default, never above
    # 64 MiB so it is valid on every current generation.
    limit = int(min(64 * _MB, max(32 * _MB, 2 * int(vmem_bytes))))
    return pltpu.CompilerParams(dimension_semantics=dimension_semantics,
                                vmem_limit_bytes=limit)


def _pick_tile(n, pref, align):
    """Largest `align`-multiple divisor of n that is <= pref (full dim if n <= pref)."""
    if n <= pref:
        return n
    t = (pref // align) * align
    while t >= align:
        if n % t == 0:
            return t
        t -= align
    # Last resort: whole dimension (correct; production dims are multiples of
    # 128 so this is not reached there).
    return n


def _pick_q_tile(length, band_width, pref=128):
    """Largest divisor of L that is <= pref, >= W-1 and 8-aligned (or == L)."""
    pref = max(pref, band_width - 1)
    for t in range(min(length, pref), 0, -1):
        if (length % t == 0 and t >= band_width - 1
                and (t % 8 == 0 or t == length)):
            return t
    raise ValueError(f"no valid query tile for L={length}, W={band_width}")


# ---------------------------------------------------------------------------
# Tiled matmul kernel (QKV projection and output projection)
# ---------------------------------------------------------------------------
def _matmul_kernel(a_ref, b_ref, o_ref, acc_ref):
    @pl.when(pl.program_id(2) == 0)
    def _():
        acc_ref[...] = jnp.zeros_like(acc_ref)

    acc_ref[...] += jnp.dot(a_ref[...], b_ref[...],
                            preferred_element_type=jnp.float32)

    @pl.when(pl.program_id(2) == pl.num_programs(2) - 1)
    def _():
        o_ref[...] = acc_ref[...].astype(o_ref.dtype)


def matmul(a, b, *, out_dtype=None, tm=512, tn=256, tk=512):
    """a: (M, K) @ b: (K, N) -> (M, N), f32 accumulation on the MXU.

    512x256x512 tiles fill the 256-wide MXU on v6e/v7x and cut HBM weight
    refetches; on v5e (4x128x128 MXU) they simply buy more reuse.  ~5 MiB of
    double-buffered VMEM at f32, half that at bf16.
    """
    M, K = a.shape
    K2, N = b.shape
    assert K == K2
    out_dtype = a.dtype if out_dtype is None else jnp.dtype(out_dtype)
    tm = _pick_tile(M, tm, 8)
    tn = _pick_tile(N, tn, 128)
    tk = _pick_tile(K, tk, 128)
    vmem_bytes = (2 * (tm * tk * a.dtype.itemsize + tk * tn * b.dtype.itemsize
                       + tm * tn * jnp.dtype(out_dtype).itemsize)
                  + tm * tn * 4)
    return pl.pallas_call(
        _matmul_kernel,
        out_shape=jax.ShapeDtypeStruct((M, N), out_dtype),
        grid_spec=pltpu.PrefetchScalarGridSpec(
            num_scalar_prefetch=0,
            grid=(M // tm, N // tn, K // tk),
            in_specs=[pl.BlockSpec((tm, tk), lambda i, j, k: (i, k)),
                      pl.BlockSpec((tk, tn), lambda i, j, k: (k, j))],
            out_specs=pl.BlockSpec((tm, tn), lambda i, j, k: (i, j)),
            scratch_shapes=[pltpu.VMEM((tm, tn), jnp.float32)],
        ),
        compiler_params=_mosaic_params(("parallel", "parallel", "arbitrary"),
                                       vmem_bytes),
        cost_estimate=pl.CostEstimate(
            flops=int(2 * M * N * K),
            transcendentals=0,
            bytes_accessed=int(M * K * a.dtype.itemsize
                               + K * N * b.dtype.itemsize
                               + M * N * jnp.dtype(out_dtype).itemsize)),
    )(a, b)


# ---------------------------------------------------------------------------
# Blocked MXU band-attention kernel
# ---------------------------------------------------------------------------
def _band_attn_kernel(past_k_ref, past_v_ref, qkv_ref, o_ref,
                      k_tail_ref, v_tail_ref, *, num_head, head_dim,
                      band_width, scale):
    H, Dh, W = num_head, head_dim, band_width
    D = H * Dh
    tq = o_ref.shape[0]
    j = pl.program_id(1)

    # At the first query tile of every sequence the "previous-tile tail" carry
    # is the learned past K/V; afterwards it holds what the previous grid step
    # wrote (grid steps run sequentially with the L-tile axis innermost).
    @pl.when(j == 0)
    def _():
        k_tail_ref[...] = past_k_ref[...]
        v_tail_ref[...] = past_v_ref[...]

    qkv = qkv_ref[...]                         # (tq, 3D), compute dtype
    q_all = qkv[:, 0:D] * scale                # fold softmax scale into q once
    k_all = qkv[:, D:2 * D]
    v_all = qkv[:, 2 * D:3 * D]
    k_bnd = k_tail_ref[...]                    # (W-1, D) boundary K (past / prev tail)
    v_bnd = v_tail_ref[...]

    # Carry this tile's last W-1 rows of K/V into the next grid step.
    k_tail_ref[...] = k_all[tq - (W - 1):, :]
    v_tail_ref[...] = v_all[tq - (W - 1):, :]

    # Relative-position band masks: query r attends keys r-(W-1) .. r.
    r_d = lax.broadcasted_iota(jnp.int32, (tq, tq), 0)
    c_d = lax.broadcasted_iota(jnp.int32, (tq, tq), 1)
    diff = r_d - c_d
    mask_diag = (diff >= 0) & (diff < W)
    r_b = lax.broadcasted_iota(jnp.int32, (tq, W - 1), 0)
    c_b = lax.broadcasted_iota(jnp.int32, (tq, W - 1), 1)
    mask_bnd = c_b >= r_b
    neg = jnp.float32(-1e30)
    nt = (((1,), (1,)), ((), ()))              # contract last dims: A @ B.T

    for h in range(H):                         # static unroll over heads
        sl = slice(h * Dh, (h + 1) * Dh)
        qh, kh, vh = q_all[:, sl], k_all[:, sl], v_all[:, sl]
        kbh, vbh = k_bnd[:, sl], v_bnd[:, sl]

        # MXU score blocks, f32 accumulation.
        s_d = lax.dot_general(qh, kh, nt, preferred_element_type=jnp.float32)
        s_b = lax.dot_general(qh, kbh, nt, preferred_element_type=jnp.float32)
        s_d = jnp.where(mask_diag, s_d, neg)
        s_b = jnp.where(mask_bnd, s_b, neg)

        # Lane-dense softmax over the (masked) key axis.
        m = jnp.maximum(jnp.max(s_d, axis=-1, keepdims=True),
                        jnp.max(s_b, axis=-1, keepdims=True))
        p_d = jnp.exp(s_d - m)
        p_b = jnp.exp(s_b - m)
        denom = (jnp.sum(p_d, axis=-1, keepdims=True)
                 + jnp.sum(p_b, axis=-1, keepdims=True))
        inv = pl.reciprocal(denom, approx=True)        # EUP slot, ~free

        pv = (jnp.dot(p_d.astype(vh.dtype), vh,
                      preferred_element_type=jnp.float32)
              + jnp.dot(p_b.astype(vbh.dtype), vbh,
                        preferred_element_type=jnp.float32))
        o_ref[:, sl] = (pv * inv).astype(o_ref.dtype)


# ---------------------------------------------------------------------------
# Parameter pre-fusion (hoisted out of the per-call path) and full forward
# ---------------------------------------------------------------------------
def prepare_band_mha_params(params, *, band_width, compute_dtype=jnp.bfloat16):
    """Pre-fuse / pre-transpose weights once; store in the compute dtype."""
    D = params['wq'].shape[0]
    w_qkv = jnp.concatenate([params['wq'].T, params['wk'].T, params['wv'].T],
                            axis=1).astype(compute_dtype)             # (D, 3D)
    wo_t = params['wo'].T.astype(compute_dtype)                       # (D, D)
    past_k = params['last_k_init'].reshape(band_width - 1, D).astype(compute_dtype)
    past_v = params['last_v_init'].reshape(band_width - 1, D).astype(compute_dtype)
    return dict(w_qkv=w_qkv, wo_t=wo_t, past_k=past_k, past_v=past_v)


def band_mha_forward(x, prepared, *, num_head, band_width):
    B, L, D = x.shape
    H = num_head
    assert D % H == 0, "dim must be a multiple of num_head"
    Dh = D // H
    W = band_width
    assert W >= 2, "band_width must be >= 2"
    cdtype = prepared['w_qkv'].dtype
    csize = jnp.dtype(cdtype).itemsize

    # Fused Q/K/V projection: x read from HBM once; the (B*L, 3D) output is
    # exactly the layout the attention kernel consumes (no transposes/concats).
    x2d = x.reshape(B * L, D).astype(cdtype)
    qkv = matmul(x2d, prepared['w_qkv'], out_dtype=cdtype)             # (B*L, 3D)

    tq = _pick_q_tile(L, W)
    nL = L // tq
    scale = float(Dh) ** -0.5

    vmem_bytes = (2 * (tq * 3 * D + tq * D) * csize        # qkv-in + out tiles
                  + 4 * (W - 1) * D * csize                # past inputs + carry
                  + 8 * tq * (tq + Dh + W) * 4)            # in-kernel f32 temps
    attn = pl.pallas_call(
        functools.partial(_band_attn_kernel, num_head=H, head_dim=Dh,
                          band_width=W, scale=scale),
        out_shape=jax.ShapeDtypeStruct((B * L, D), cdtype),
        grid_spec=pltpu.PrefetchScalarGridSpec(
            num_scalar_prefetch=0,
            grid=(B, nL),
            in_specs=[
                pl.BlockSpec((W - 1, D), lambda b, j: (0, 0)),         # past K
                pl.BlockSpec((W - 1, D), lambda b, j: (0, 0)),         # past V
                pl.BlockSpec((tq, 3 * D), lambda b, j: (b * nL + j, 0)),
            ],
            out_specs=pl.BlockSpec((tq, D), lambda b, j: (b * nL + j, 0)),
            scratch_shapes=[pltpu.VMEM((W - 1, D), cdtype),
                            pltpu.VMEM((W - 1, D), cdtype)],
        ),
        compiler_params=_mosaic_params(("parallel", "arbitrary"), vmem_bytes),
        cost_estimate=pl.CostEstimate(
            flops=int(4 * B * L * D * (tq + W - 1)),
            transcendentals=int(B * L * H * (tq + W - 1)),
            bytes_accessed=int((4 * B * L * D + 2 * (W - 1) * D) * csize)),
    )(prepared['past_k'], prepared['past_v'], qkv)

    # Output projection straight off the (B*L, D) attention result.
    out = matmul(attn, prepared['wo_t'], out_dtype=x.dtype)
    # TODO(synk): the module's streaming-state refresh (self.last_k/self.last_v,
    # is_refresh) is host-side nn.Module mutable state; return the last
    # band_width K/V rows from the wrapper if a stateful carry is needed.
    return out.reshape(B, L, D)


# ---------------------------------------------------------------------------
# Pure-JAX reference (mirrors the PyTorch forward with fresh hidden state)
# ---------------------------------------------------------------------------
def band_mha_ref(x, params, *, num_head, band_width):
    B, L, D = x.shape
    H, Dh = num_head, D // num_head
    hp = jax.lax.Precision.HIGHEST
    q = jnp.einsum('bld,ed->ble', x, params['wq'], precision=hp).reshape(B, L, H, Dh)
    k = jnp.einsum('bld,ed->ble', x, params['wk'], precision=hp).reshape(B, L, H, Dh)
    v = jnp.einsum('bld,ed->ble', x, params['wv'], precision=hp).reshape(B, L, H, Dh)
    lk = jnp.broadcast_to(params['last_k_init'][None], (B, band_width - 1, H, Dh))
    lv = jnp.broadcast_to(params['last_v_init'][None], (B, band_width - 1, H, Dh))
    k_ext = jnp.concatenate([lk, k], axis=1)
    v_ext = jnp.concatenate([lv, v], axis=1)
    scores = jnp.stack(
        [jnp.einsum('blhd,blhd->blh', q, k_ext[:, i:i + L], precision=hp)
         for i in range(band_width)], axis=2) * (Dh ** -0.5)
    attn = jax.nn.softmax(scores, axis=2)
    out_acc = sum(attn[:, :, i, :, None] * v_ext[:, i:i + L]
                  for i in range(band_width))
    return jnp.einsum('bld,ed->ble', out_acc.reshape(B, L, D), params['wo'],
                      precision=hp)


if __name__ == "__main__":
    B, L = 2, 8
    dim, num_head, band_width = 32, 4, 4
    head_dim = dim // num_head

    key = jax.random.PRNGKey(0)
    kx, kq, kk, kv, ko, klk, klv = jax.random.split(key, 7)
    bound = 1.0 / (dim ** 0.5)
    params = dict(
        wq=jax.random.uniform(kq, (dim, dim), jnp.float32, -bound, bound),
        wk=jax.random.uniform(kk, (dim, dim), jnp.float32, -bound, bound),
        wv=jax.random.uniform(kv, (dim, dim), jnp.float32, -bound, bound),
        wo=jax.random.uniform(ko, (dim, dim), jnp.float32, -bound, bound),
        last_k_init=jax.random.normal(klk, (band_width - 1, num_head, head_dim),
                                      jnp.float32),
        last_v_init=jax.random.normal(klv, (band_width - 1, num_head, head_dim),
                                      jnp.float32),
    )
    x = jax.random.normal(kx, (B, L, dim), jnp.float32)

    ref = band_mha_ref(x, params, num_head=num_head, band_width=band_width)
    fwd = jax.jit(functools.partial(band_mha_forward,
                                    num_head=num_head, band_width=band_width))

    # f32 compute path (parity with the PyTorch f32 forward).
    prep32 = prepare_band_mha_params(params, band_width=band_width,
                                     compute_dtype=jnp.float32)
    out32 = jax.block_until_ready(fwd(x, prep32))
    assert out32.shape == (B, L, dim) and out32.dtype == x.dtype
    err32 = float(jnp.max(jnp.abs(out32 - ref)))
    assert err32 < 1e-2, f"f32 path max abs error {err32}"

    # bf16 compute path (MXU headline rate, f32 accumulation) — fast default.
    prep16 = prepare_band_mha_params(params, band_width=band_width,
                                     compute_dtype=jnp.bfloat16)
    out16 = jax.block_until_ready(fwd(x, prep16))
    assert out16.shape == (B, L, dim) and out16.dtype == x.dtype
    err16 = float(jnp.max(jnp.abs(out16 - ref)))
    assert err16 < 5e-2, f"bf16 path max abs error {err16}"

    print("KERNEL_OK")
</pallas_src>

<mosaic_0001>
module attributes {stable_mosaic.version = 11 : i64} {
  func.func @_matmul_kernel(%arg0: i32, %arg1: i32, %arg2: i32, %arg3: memref<16x32xf32, #tpu.memory_space<vmem>>, %arg4: memref<32x32xf32, #tpu.memory_space<vmem>>, %arg5: memref<16x32xf32, #tpu.memory_space<vmem>>, %arg6: memref<16x32xf32, #tpu.memory_space<vmem>>) attributes {dimension_semantics = [#tpu.dimension_semantics<parallel>, #tpu.dimension_semantics<parallel>, #tpu.dimension_semantics<arbitrary>], iteration_bounds = array<i64: 1, 1, 1>, scalar_prefetch = 0 : i64, scratch_operands = 1 : i64, tpu.core_type = #tpu.core_type<tc>, window_params = [{transform_indices = @transform_0, window_bounds = array<i64: 16, 32>}, {transform_indices = @transform_1, window_bounds = array<i64: 32, 32>}, {transform_indices = @transform_2, window_bounds = array<i64: 16, 32>}]} {
    %c0_i32 = arith.constant 0 : i32
    %0 = arith.cmpi eq, %arg2, %c0_i32 : i32
    %1 = arith.extui %0 : i1 to i32
    %c0_i32_0 = arith.constant 0 : i32
    %2 = arith.cmpi ne, %1, %c0_i32_0 : i32
    scf.if %2 {
      %cst_10 = arith.constant 0.000000e+00 : f32
      %12 = vector.broadcast %cst_10 : f32 to vector<16x32xf32>
      %c0_11 = arith.constant 0 : index
      %c0_12 = arith.constant 0 : index
      %13 = vector.load %arg6[%c0_11, %c0_12] : memref<16x32xf32, #tpu.memory_space<vmem>>, vector<16x32xf32>
      tpu.vector_store %arg6[%c0_11, %c0_12], %12 {strides = array<i32>} : memref<16x32xf32, #tpu.memory_space<vmem>>, vector<16x32xf32>,
    } else {
    }
    %c0 = arith.constant 0 : index
    %c0_1 = arith.constant 0 : index
    %3 = vector.load %arg6[%c0, %c0_1] : memref<16x32xf32, #tpu.memory_space<vmem>>, vector<16x32xf32>
    %c0_2 = arith.constant 0 : index
    %c0_3 = arith.constant 0 : index
    %4 = vector.load %arg3[%c0_2, %c0_3] : memref<16x32xf32, #tpu.memory_space<vmem>>, vector<16x32xf32>
    %c0_4 = arith.constant 0 : index
    %c0_5 = arith.constant 0 : index
    %5 = vector.load %arg4[%c0_4, %c0_5] : memref<32x32xf32, #tpu.memory_space<vmem>>, vector<32x32xf32>
    %cst = arith.constant dense<0.000000e+00> : vector<16x32xf32>
    %6 = tpu.matmul %4, %5, %cst {dimension_numbers = #tpu.dot_dimension_numbers<[1], [0], [0], [1], [0, 0, 1, 1], [], []>} : vector<16x32xf32>, vector<32x32xf32>, vector<16x32xf32> -> vector<16x32xf32>
    %7 = arith.addf %3, %6 : vector<16x32xf32>
    %c0_6 = arith.constant 0 : index
    %c0_7 = arith.constant 0 : index
    %8 = vector.load %arg6[%c0_6, %c0_7] : memref<16x32xf32, #tpu.memory_space<vmem>>, vector<16x32xf32>
    tpu.vector_store %arg6[%c0_6, %c0_7], %7 {strides = array<i32>} : memref<16x32xf32, #tpu.memory_space<vmem>>, vector<16x32xf32>,
    %c0_i32_8 = arith.constant 0 : i32
    %9 = arith.cmpi eq, %arg2, %c0_i32_8 : i32
    %10 = arith.extui %9 : i1 to i32
    %c0_i32_9 = arith.constant 0 : i32
    %11 = arith.cmpi ne, %10, %c0_i32_9 : i32
    scf.if %11 {
      %c0_10 = arith.constant 0 : index
      %c0_11 = arith.constant 0 : index
      %12 = vector.load %arg6[%c0_10, %c0_11] : memref<16x32xf32, #tpu.memory_space<vmem>>, vector<16x32xf32>
      %c0_12 = arith.constant 0 : index
      %c0_13 = arith.constant 0 : index
      %13 = vector.load %arg5[%c0_12, %c0_13] : memref<16x32xf32, #tpu.memory_space<vmem>>, vector<16x32xf32>
      tpu.vector_store %arg5[%c0_12, %c0_13], %12 {strides = array<i32>} : memref<16x32xf32, #tpu.memory_space<vmem>>, vector<16x32xf32>,
    } else {
    }
    return
  }
  func.func @transform_0(%arg0: i32, %arg1: i32, %arg2: i32) -> (i32, i32) {
    %c0_i32 = arith.constant 0 : i32
    return %arg0, %arg2 : i32, i32
  }
  func.func @transform_1(%arg0: i32, %arg1: i32, %arg2: i32) -> (i32, i32) {
    %c0_i32 = arith.constant 0 : i32
    return %arg2, %arg1 : i32, i32
  }
  func.func @transform_2(%arg0: i32, %arg1: i32, %arg2: i32) -> (i32, i32) {
    %c0_i32 = arith.constant 0 : i32
    return %arg0, %arg1 : i32, i32
  }
}

module attributes {stable_mosaic.version = 11 : i64} {
  func.func @_band_attn_kernel(%arg0: i32, %arg1: i32, %arg2: memref<3x32xf32, #tpu.memory_space<vmem>>, %arg3: memref<3x32xf32, #tpu.memory_space<vmem>>, %arg4: memref<8x96xf32, #tpu.memory_space<vmem>>, %arg5: memref<8x32xf32, #tpu.memory_space<vmem>>, %arg6: memref<3x32xf32, #tpu.memory_space<vmem>>, %arg7: memref<3x32xf32, #tpu.memory_space<vmem>>) attributes {dimension_semantics = [#tpu.dimension_semantics<parallel>, #tpu.dimension_semantics<arbitrary>], iteration_bounds = array<i64: 2, 1>, scalar_prefetch = 0 : i64, scratch_operands = 2 : i64, tpu.core_type = #tpu.core_type<tc>, window_params = [{pipeline_mode = #tpu.pipeline_mode<synchronous>, transform_indices = @transform_0, window_bounds = array<i64: 3, 32>}, {pipeline_mode = #tpu.pipeline_mode<synchronous>, transform_indices = @transform_1, window_bounds = array<i64: 3, 32>}, {transform_indices = @transform_2, window_bounds = array<i64: 8, 96>}, {transform_indices = @transform_3, window_bounds = array<i64: 8, 32>}]} {
    %c0_i32 = arith.constant 0 : i32
    %0 = arith.cmpi eq, %arg1, %c0_i32 : i32
    %1 = arith.extui %0 : i1 to i32
    %c0_i32_0 = arith.constant 0 : i32
    %2 = arith.cmpi ne, %1, %c0_i32_0 : i32
    scf.if %2 {
      %c0_56 = arith.constant 0 : index
      %c0_57 = arith.constant 0 : index
      %162 = vector.load %arg2[%c0_56, %c0_57] : memref<3x32xf32, #tpu.memory_space<vmem>>, vector<3x32xf32>
      %c0_58 = arith.constant 0 : index
      %c0_59 = arith.constant 0 : index
      %163 = vector.load %arg6[%c0_58, %c0_59] : memref<3x32xf32, #tpu.memory_space<vmem>>, vector<3x32xf32>
      tpu.vector_store %arg6[%c0_58, %c0_59], %162 {strides = array<i32>} : memref<3x32xf32, #tpu.memory_space<vmem>>, vector<3x32xf32>,
      %c0_60 = arith.constant 0 : index
      %c0_61 = arith.constant 0 : index
      %164 = vector.load %arg3[%c0_60, %c0_61] : memref<3x32xf32, #tpu.memory_space<vmem>>, vector<3x32xf32>
      %c0_62 = arith.constant 0 : index
      %c0_63 = arith.constant 0 : index
      %165 = vector.load %arg7[%c0_62, %c0_63] : memref<3x32xf32, #tpu.memory_space<vmem>>, vector<3x32xf32>
      tpu.vector_store %arg7[%c0_62, %c0_63], %164 {strides = array<i32>} : memref<3x32xf32, #tpu.memory_space<vmem>>, vector<3x32xf32>,
    } else {
    }
    %c0 = arith.constant 0 : index
    %c0_1 = arith.constant 0 : index
    %3 = vector.load %arg4[%c0, %c0_1] : memref<8x96xf32, #tpu.memory_space<vmem>>, vector<8x96xf32>
    %4 = vector.extract_strided_slice %3 {offsets = [0, 0], sizes = [8, 32], strides = [1, 1]} : vector<8x96xf32> to vector<8x32xf32>
    %cst = arith.constant 0.353553385 : f32
    %5 = vector.broadcast %cst : f32 to vector<8x32xf32>
    %6 = arith.mulf %4, %5 : vector<8x32xf32>
    %7 = vector.extract_strided_slice %3 {offsets = [0, 32], sizes = [8, 32], strides = [1, 1]} : vector<8x96xf32> to vector<8x32xf32>
    %8 = vector.extract_strided_slice %3 {offsets = [0, 64], sizes = [8, 32], strides = [1, 1]} : vector<8x96xf32> to vector<8x32xf32>
    %c0_2 = arith.constant 0 : index
    %c0_3 = arith.constant 0 : index
    %9 = vector.load %arg6[%c0_2, %c0_3] : memref<3x32xf32, #tpu.memory_space<vmem>>, vector<3x32xf32>
    %c0_4 = arith.constant 0 : index
    %c0_5 = arith.constant 0 : index
    %10 = vector.load %arg7[%c0_4, %c0_5] : memref<3x32xf32, #tpu.memory_space<vmem>>, vector<3x32xf32>
    %11 = vector.extract_strided_slice %7 {offsets = [5, 0], sizes = [3, 32], strides = [1, 1]} : vector<8x32xf32> to vector<3x32xf32>
    %c0_6 = arith.constant 0 : index
    %c0_7 = arith.constant 0 : index
    %12 = vector.load %arg6[%c0_6, %c0_7] : memref<3x32xf32, #tpu.memory_space<vmem>>, vector<3x32xf32>
    tpu.vector_store %arg6[%c0_6, %c0_7], %11 {strides = array<i32>} : memref<3x32xf32, #tpu.memory_space<vmem>>, vector<3x32xf32>,
    %13 = vector.extract_strided_slice %8 {offsets = [5, 0], sizes = [3, 32], strides = [1, 1]} : vector<8x32xf32> to vector<3x32xf32>
    %c0_8 = arith.constant 0 : index
    %c0_9 = arith.constant 0 : index
    %14 = vector.load %arg7[%c0_8, %c0_9] : memref<3x32xf32, #tpu.memory_space<vmem>>, vector<3x32xf32>
    tpu.vector_store %arg7[%c0_8, %c0_9], %13 {strides = array<i32>} : memref<3x32xf32, #tpu.memory_space<vmem>>, vector<3x32xf32>,
    %15 = tpu.iota {dimensions = array<i32: 0>} : vector<8x8xi32>
    %16 = tpu.iota {dimensions = array<i32: 1>} : vector<8x8xi32>
    %17 = arith.subi %15, %16 : vector<8x8xi32>
    %c0_i32_10 = arith.constant 0 : i32
    %18 = vector.broadcast %c0_i32_10 : i32 to vector<8x8xi32>
    %19 = arith.cmpi sge, %17, %18 : vector<8x8xi32>
    %c4_i32 = arith.constant 4 : i32
    %20 = vector.broadcast %c4_i32 : i32 to vector<8x8xi32>
    %21 = arith.cmpi slt, %17, %20 : vector<8x8xi32>
    %22 = arith.andi %19, %21 : vector<8x8xi1>
    %23 = tpu.iota {dimensions = array<i32: 0>} : vector<8x3xi32>
    %24 = tpu.iota {dimensions = array<i32: 1>} : vector<8x3xi32>
    %25 = arith.cmpi sge, %24, %23 : vector<8x3xi32>
    %26 = vector.extract_strided_slice %6 {offsets = [0, 0], sizes = [8, 8], strides = [1, 1]} : vector<8x32xf32> to vector<8x8xf32>
    %27 = vector.extract_strided_slice %7 {offsets = [0, 0], sizes = [8, 8], strides = [1, 1]} : vector<8x32xf32> to vector<8x8xf32>
    %28 = vector.extract_strided_slice %8 {offsets = [0, 0], sizes = [8, 8], strides = [1, 1]} : vector<8x32xf32> to vector<8x8xf32>
    %29 = vector.extract_strided_slice %9 {offsets = [0, 0], sizes = [3, 8], strides = [1, 1]} : vector<3x32xf32> to vector<3x8xf32>
    %30 = vector.extract_strided_slice %10 {offsets = [0, 0], sizes = [3, 8], strides = [1, 1]} : vector<3x32xf32> to vector<3x8xf32>
    %cst_11 = arith.constant dense<0.000000e+00> : vector<8x8xf32>
    %31 = tpu.matmul %26, %27, %cst_11 {dimension_numbers = #tpu.dot_dimension_numbers<[1], [1], [0], [0], [0, 0, 1, 0], [], []>} : vector<8x8xf32>, vector<8x8xf32>, vector<8x8xf32> -> vector<8x8xf32>
    %cst_12 = arith.constant dense<0.000000e+00> : vector<8x3xf32>
    %32 = tpu.matmul %26, %29, %cst_12 {dimension_numbers = #tpu.dot_dimension_numbers<[1], [1], [0], [0], [0, 0, 1, 0], [], []>} : vector<8x8xf32>, vector<3x8xf32>, vector<8x3xf32> -> vector<8x3xf32>
    %cst_13 = arith.constant -1.000000e+30 : f32
    %33 = vector.broadcast %cst_13 : f32 to vector<8x8xf32>
    %34 = arith.select %22, %31, %33 : vector<8x8xi1>, vector<8x8xf32>
    %cst_14 = arith.constant -1.000000e+30 : f32
    %35 = vector.broadcast %cst_14 : f32 to vector<8x3xf32>
    %36 = arith.select %25, %32, %35 : vector<8x3xi1>, vector<8x3xf32>
    %cst_15 = arith.constant dense<0xFF800000> : vector<8xf32>
    %37 = vector.multi_reduction <maximumf>, %34, %cst_15 [1] : vector<8x8xf32> to vector<8xf32>
    %38 = vector.shape_cast %37 : vector<8xf32> to vector<8x1xf32>
    %cst_16 = arith.constant dense<0xFF800000> : vector<8xf32>
    %39 = vector.multi_reduction <maximumf>, %36, %cst_16 [1] : vector<8x3xf32> to vector<8xf32>
    %40 = vector.shape_cast %39 : vector<8xf32> to vector<8x1xf32>
    %41 = arith.maximumf %38, %40 : vector<8x1xf32>
    %42 = vector.broadcast %41 : vector<8x1xf32> to vector<8x8xf32>
    %43 = arith.subf %34, %42 : vector<8x8xf32>
    %44 = math.exp %43 : vector<8x8xf32>
    %45 = vector.broadcast %41 : vector<8x1xf32> to vector<8x3xf32>
    %46 = arith.subf %36, %45 : vector<8x3xf32>
    %47 = math.exp %46 : vector<8x3xf32>
    %cst_17 = arith.constant dense<0.000000e+00> : vector<8xf32>
    %48 = vector.multi_reduction <add>, %44, %cst_17 [1] : vector<8x8xf32> to vector<8xf32>
    %49 = vector.shape_cast %48 : vector<8xf32> to vector<8x1xf32>
    %cst_18 = arith.constant dense<0.000000e+00> : vector<8xf32>
    %50 = vector.multi_reduction <add>, %47, %cst_18 [1] : vector<8x3xf32> to vector<8xf32>
    %51 = vector.shape_cast %50 : vector<8xf32> to vector<8x1xf32>
    %52 = arith.addf %49, %51 : vector<8x1xf32>
    %53 = tpu.reciprocal %52 {approx = true} : vector<8x1xf32> -> vector<8x1xf32>
    %cst_19 = arith.constant dense<0.000000e+00> : vector<8x8xf32>
    %54 = tpu.matmul %44, %28, %cst_19 {dimension_numbers = #tpu.dot_dimension_numbers<[1], [0], [0], [1], [0, 0, 1, 1], [], []>} : vector<8x8xf32>, vector<8x8xf32>, vector<8x8xf32> -> vector<8x8xf32>
    %cst_20 = arith.constant dense<0.000000e+00> : vector<8x8xf32>
    %55 = tpu.matmul %47, %30, %cst_20 {dimension_numbers = #tpu.dot_dimension_numbers<[1], [0], [0], [1], [0, 0, 1, 1], [], []>} : vector<8x3xf32>, vector<3x8xf32>, vector<8x8xf32> -> vector<8x8xf32>
    %56 = arith.addf %54, %55 : vector<8x8xf32>
    %57 = vector.broadcast %53 : vector<8x1xf32> to vector<8x8xf32>
    %58 = arith.mulf %56, %57 : vector<8x8xf32>
    %c0_21 = arith.constant 0 : index
    %c0_22 = arith.constant 0 : index
    %59 = vector.load %arg5[%c0_21, %c0_22] : memref<8x32xf32, #tpu.memory_space<vmem>>, vector<8x8xf32>
    tpu.vector_store %arg5[%c0_21, %c0_22], %58 {strides = array<i32>} : memref<8x32xf32, #tpu.memory_space<vmem>>, vector<8x8xf32>,
    %60 = vector.extract_strided_slice %6 {offsets = [0, 8], sizes = [8, 8], strides = [1, 1]} : vector<8x32xf32> to vector<8x8xf32>
    %61 = vector.extract_strided_slice %7 {offsets = [0, 8], sizes = [8, 8], strides = [1, 1]} : vector<8x32xf32> to vector<8x8xf32>
    %62 = vector.extract_strided_slice %8 {offsets = [0, 8], sizes = [8, 8], strides = [1, 1]} : vector<8x32xf32> to vector<8x8xf32>
    %63 = vector.extract_strided_slice %9 {offsets = [0, 8], sizes = [3, 8], strides = [1, 1]} : vector<3x32xf32> to vector<3x8xf32>
    %64 = vector.extract_strided_slice %10 {offsets = [0, 8], sizes = [3, 8], strides = [1, 1]} : vector<3x32xf32> to vector<3x8xf32>
    %cst_23 = arith.constant dense<0.000000e+00> : vector<8x8xf32>
    %65 = tpu.matmul %60, %61, %cst_23 {dimension_numbers = #tpu.dot_dimension_numbers<[1], [1], [0], [0], [0, 0, 1, 0], [], []>} : vector<8x8xf32>, vector<8x8xf32>, vector<8x8xf32> -> vector<8x8xf32>
    %cst_24 = arith.constant dense<0.000000e+00> : vector<8x3xf32>
    %66 = tpu.matmul %60, %63, %cst_24 {dimension_numbers = #tpu.dot_dimension_numbers<[1], [1], [0], [0], [0, 0, 1, 0], [], []>} : vector<8x8xf32>, vector<3x8xf32>, vector<8x3xf32> -> vector<8x3xf32>
    %cst_25 = arith.constant -1.000000e+30 : f32
    %67 = vector.broadcast %cst_25 : f32 to vector<8x8xf32>
    %68 = arith.select %22, %65, %67 : vector<8x8xi1>, vector<8x8xf32>
    %cst_26 = arith.constant -1.000000e+30 : f32
    %69 = vector.broadcast %cst_26 : f32 to vector<8x3xf32>
    %70 = arith.select %25, %66, %69 : vector<8x3xi1>, vector<8x3xf32>
    %cst_27 = arith.constant dense<0xFF800000> : vector<8xf32>
    %71 = vector.multi_reduction <maximumf>, %68, %cst_27 [1] : vector<8x8xf32> to vector<8xf32>
    %72 = vector.shape_cast %71 : vector<8xf32> to vector<8x1xf32>
    %cst_28 = arith.constant dense<0xFF800000> : vector<8xf32>
    %73 = vector.multi_reduction <maximumf>, %70, %cst_28 [1] : vector<8x3xf32> to vector<8xf32>
    %74 = vector.shape_cast %73 : vector<8xf32> to vector<8x1xf32>
    %75 = arith.maximumf %72, %74 : vector<8x1xf32>
    %76 = vector.broadcast %75 : vector<8x1xf32> to vector<8x8xf32>
    %77 = arith.subf %68, %76 : vector<8x8xf32>
    %78 = math.exp %77 : vector<8x8xf32>
    %79 = vector.broadcast %75 : vector<8x1xf32> to vector<8x3xf32>
    %80 = arith.subf %70, %79 : vector<8x3xf32>
    %81 = math.exp %80 : vector<8x3xf32>
    %cst_29 = arith.constant dense<0.000000e+00> : vector<8xf32>
    %82 = vector.multi_reduction <add>, %78, %cst_29 [1] : vector<8x8xf32> to vector<8xf32>
    %83 = vector.shape_cast %82 : vector<8xf32> to vector<8x1xf32>
    %cst_30 = arith.constant dense<0.000000e+00> : vector<8xf32>
    %84 = vector.multi_reduction <add>, %81, %cst_30 [1] : vector<8x3xf32> to vector<8xf32>
    %85 = vector.shape_cast %84 : vector<8xf32> to vector<8x1xf32>
    %86 = arith.addf %83, %85 : vector<8x1xf32>
    %87 = tpu.reciprocal %86 {approx = true} : vector<8x1xf32> -> vector<8x1xf32>
    %cst_31 = arith.constant dense<0.000000e+00> : vector<8x8xf32>
    %88 = tpu.matmul %78, %62, %cst_31 {dimension_numbers = #tpu.dot_dimension_numbers<[1], [0], [0], [1], [0, 0, 1, 1], [], []>} : vector<8x8xf32>, vector<8x8xf32>, vector<8x8xf32> -> vector<8x8xf32>
    %cst_32 = arith.constant dense<0.000000e+00> : vector<8x8xf32>
    %89 = tpu.matmul %81, %64, %cst_32 {dimension_numbers = #tpu.dot_dimension_numbers<[1], [0], [0], [1], [0, 0, 1, 1], [], []>} : vector<8x3xf32>, vector<3x8xf32>, vector<8x8xf32> -> vector<8x8xf32>
    %90 = arith.addf %88, %89 : vector<8x8xf32>
    %91 = vector.broadcast %87 : vector<8x1xf32> to vector<8x8xf32>
    %92 = arith.mulf %90, %91 : vector<8x8xf32>
    %c0_33 = arith.constant 0 : index
    %c8 = arith.constant 8 : index
    %93 = vector.load %arg5[%c0_33, %c8] : memref<8x32xf32, #tpu.memory_space<vmem>>, vector<8x8xf32>
    tpu.vector_store %arg5[%c0_33, %c8], %92 {strides = array<i32>} : memref<8x32xf32, #tpu.memory_space<vmem>>, vector<8x8xf32>,
    %94 = vector.extract_strided_slice %6 {offsets = [0, 16], sizes = [8, 8], strides = [1, 1]} : vector<8x32xf32> to vector<8x8xf32>
    %95 = vector.extract_strided_slice %7 {offsets = [0, 16], sizes = [8, 8], strides = [1, 1]} : vector<8x32xf32> to vector<8x8xf32>
    %96 = vector.extract_strided_slice %8 {offsets = [0, 16], sizes = [8, 8], strides = [1, 1]} : vector<8x32xf32> to vector<8x8xf32>
    %97 = vector.extract_strided_slice %9 {offsets = [0, 16], sizes = [3, 8], strides = [1, 1]} : vector<3x32xf32> to vector<3x8xf32>
    %98 = vector.extract_strided_slice %10 {offsets = [0, 16], sizes = [3, 8], strides = [1, 1]} : vector<3x32xf32> to vector<3x8xf32>
    %cst_34 = arith.constant dense<0.000000e+00> : vector<8x8xf32>
    %99 = tpu.matmul %94, %95, %cst_34 {dimension_numbers = #tpu.dot_dimension_numbers<[1], [1], [0], [0], [0, 0, 1, 0], [], []>} : vector<8x8xf32>, vector<8x8xf32>, vector<8x8xf32> -> vector<8x8xf32>
    %cst_35 = arith.constant dense<0.000000e+00> : vector<8x3xf32>
    %100 = tpu.matmul %94, %97, %cst_35 {dimension_numbers = #tpu.dot_dimension_numbers<[1], [1], [0], [0], [0, 0, 1, 0], [], []>} : vector<8x8xf32>, vector<3x8xf32>, vector<8x3xf32> -> vector<8x3xf32>
    %cst_36 = arith.constant -1.000000e+30 : f32
    %101 = vector.broadcast %cst_36 : f32 to vector<8x8xf32>
    %102 = arith.select %22, %99, %101 : vector<8x8xi1>, vector<8x8xf32>
    %cst_37 = arith.constant -1.000000e+30 : f32
    %103 = vector.broadcast %cst_37 : f32 to vector<8x3xf32>
    %104 = arith.select %25, %100, %103 : vector<8x3xi1>, vector<8x3xf32>
    %cst_38 = arith.constant dense<0xFF800000> : vector<8xf32>
    %105 = vector.multi_reduction <maximumf>, %102, %cst_38 [1] : vector<8x8xf32> to vector<8xf32>
    %106 = vector.shape_cast %105 : vector<8xf32> to vector<8x1xf32>
    %cst_39 = arith.constant dense<0xFF800000> : vector<8xf32>
    %107 = vector.multi_reduction <maximumf>, %104, %cst_39 [1] : vector<8x3xf32> to vector<8xf32>
    %108 = vector.shape_cast %107 : vector<8xf32> to vector<8x1xf32>
    %109 = arith.maximumf %106, %108 : vector<8x1xf32>
    %110 = vector.broadcast %109 : vector<8x1xf32> to vector<8x8xf32>
    %111 = arith.subf %102, %110 : vector<8x8xf32>
    %112 = math.exp %111 : vector<8x8xf32>
    %113 = vector.broadcast %109 : vector<8x1xf32> to vector<8x3xf32>
    %114 = arith.subf %104, %113 : vector<8x3xf32>
    %115 = math.exp %114 : vector<8x3xf32>
    %cst_40 = arith.constant dense<0.000000e+00> : vector<8xf32>
    %116 = vector.multi_reduction <add>, %112, %cst_40 [1] : vector<8x8xf32> to vector<8xf32>
    %117 = vector.shape_cast %116 : vector<8xf32> to vector<8x1xf32>
    %cst_41 = arith.constant dense<0.000000e+00> : vector<8xf32>
    %118 = vector.multi_reduction <add>, %115, %cst_41 [1] : vector<8x3xf32> to vector<8xf32>
    %119 = vector.shape_cast %118 : vector<8xf32> to vector<8x1xf32>
    %120 = arith.addf %117, %119 : vector<8x1xf32>
    %121 = tpu.reciprocal %120 {approx = true} : vector<8x1xf32> -> vector<8x1xf32>
    %cst_42 = arith.constant dense<0.000000e+00> : vector<8x8xf32>
    %122 = tpu.matmul %112, %96, %cst_42 {dimension_numbers = #tpu.dot_dimension_numbers<[1], [0], [0], [1], [0, 0, 1, 1], [], []>} : vector<8x8xf32>, vector<8x8xf32>, vector<8x8xf32> -> vector<8x8xf32>
    %cst_43 = arith.constant dense<0.000000e+00> : vector<8x8xf32>
    %123 = tpu.matmul %115, %98, %cst_43 {dimension_numbers = #tpu.dot_dimension_numbers<[1], [0], [0], [1], [0, 0, 1, 1], [], []>} : vector<8x3xf32>, vector<3x8xf32>, vector<8x8xf32> -> vector<8x8xf32>
    %124 = arith.addf %122, %123 : vector<8x8xf32>
    %125 = vector.broadcast %121 : vector<8x1xf32> to vector<8x8xf32>
    %126 = arith.mulf %124, %125 : vector<8x8xf32>
    %c0_44 = arith.constant 0 : index
    %c16 = arith.constant 16 : index
    %127 = vector.load %arg5[%c0_44, %c16] : memref<8x32xf32, #tpu.memory_space<vmem>>, vector<8x8xf32>
    tpu.vector_store %arg5[%c0_44, %c16], %126 {strides = array<i32>} : memref<8x32xf32, #tpu.memory_space<vmem>>, vector<8x8xf32>,
    %128 = vector.extract_strided_slice %6 {offsets = [0, 24], sizes = [8, 8], strides = [1, 1]} : vector<8x32xf32> to vector<8x8xf32>
    %129 = vector.extract_strided_slice %7 {offsets = [0, 24], sizes = [8, 8], strides = [1, 1]} : vector<8x32xf32> to vector<8x8xf32>
    %130 = vector.extract_strided_slice %8 {offsets = [0, 24], sizes = [8, 8], strides = [1, 1]} : vector<8x32xf32> to vector<8x8xf32>
    %131 = vector.extract_strided_slice %9 {offsets = [0, 24], sizes = [3, 8], strides = [1, 1]} : vector<3x32xf32> to vector<3x8xf32>
    %132 = vector.extract_strided_slice %10 {offsets = [0, 24], sizes = [3, 8], strides = [1, 1]} : vector<3x32xf32> to vector<3x8xf32>
    %cst_45 = arith.constant dense<0.000000e+00> : vector<8x8xf32>
    %133 = tpu.matmul %128, %129, %cst_45 {dimension_numbers = #tpu.dot_dimension_numbers<[1], [1], [0], [0], [0, 0, 1, 0], [], []>} : vector<8x8xf32>, vector<8x8xf32>, vector<8x8xf32> -> vector<8x8xf32>
    %cst_46 = arith.constant dense<0.000000e+00> : vector<8x3xf32>
    %134 = tpu.matmul %128, %131, %cst_46 {dimension_numbers = #tpu.dot_dimension_numbers<[1], [1], [0], [0], [0, 0, 1, 0], [], []>} : vector<8x8xf32>, vector<3x8xf32>, vector<8x3xf32> -> vector<8x3xf32>
    %cst_47 = arith.constant -1.000000e+30 : f32
    %135 = vector.broadcast %cst_47 : f32 to vector<8x8xf32>
    %136 = arith.select %22, %133, %135 : vector<8x8xi1>, vector<8x8xf32>
    %cst_48 = arith.constant -1.000000e+30 : f32
    %137 = vector.broadcast %cst_48 : f32 to vector<8x3xf32>
    %138 = arith.select %25, %134, %137 : vector<8x3xi1>, vector<8x3xf32>
    %cst_49 = arith.constant dense<0xFF800000> : vector<8xf32>
    %139 = vector.multi_reduction <maximumf>, %136, %cst_49 [1] : vector<8x8xf32> to vector<8xf32>
    %140 = vector.shape_cast %139 : vector<8xf32> to vector<8x1xf32>
    %cst_50 = arith.constant dense<0xFF800000> : vector<8xf32>
    %141 = vector.multi_reduction <maximumf>, %138, %cst_50 [1] : vector<8x3xf32> to vector<8xf32>
    %142 = vector.shape_cast %141 : vector<8xf32> to vector<8x1xf32>
    %143 = arith.maximumf %140, %142 : vector<8x1xf32>
    %144 = vector.broadcast %143 : vector<8x1xf32> to vector<8x8xf32>
    %145 = arith.subf %136, %144 : vector<8x8xf32>
    %146 = math.exp %145 : vector<8x8xf32>
    %147 = vector.broadcast %143 : vector<8x1xf32> to vector<8x3xf32>
    %148 = arith.subf %138, %147 : vector<8x3xf32>
    %149 = math.exp %148 : vector<8x3xf32>
    %cst_51 = arith.constant dense<0.000000e+00> : vector<8xf32>
    %150 = vector.multi_reduction <add>, %146, %cst_51 [1] : vector<8x8xf32> to vector<8xf32>
    %151 = vector.shape_cast %150 : vector<8xf32> to vector<8x1xf32>
    %cst_52 = arith.constant dense<0.000000e+00> : vector<8xf32>
    %152 = vector.multi_reduction <add>, %149, %cst_52 [1] : vector<8x3xf32> to vector<8xf32>
    %153 = vector.shape_cast %152 : vector<8xf32> to vector<8x1xf32>
    %154 = arith.addf %151, %153 : vector<8x1xf32>
    %155 = tpu.reciprocal %154 {approx = true} : vector<8x1xf32> -> vector<8x1xf32>
    %cst_53 = arith.constant dense<0.000000e+00> : vector<8x8xf32>
    %156 = tpu.matmul %146, %130, %cst_53 {dimension_numbers = #tpu.dot_dimension_numbers<[1], [0], [0], [1], [0, 0, 1, 1], [], []>} : vector<8x8xf32>, vector<8x8xf32>, vector<8x8xf32> -> vector<8x8xf32>
    %cst_54 = arith.constant dense<0.000000e+00> : vector<8x8xf32>
    %157 = tpu.matmul %149, %132, %cst_54 {dimension_numbers = #tpu.dot_dimension_numbers<[1], [0], [0], [1], [0, 0, 1, 1], [], []>} : vector<8x3xf32>, vector<3x8xf32>, vector<8x8xf32> -> vector<8x8xf32>
    %158 = arith.addf %156, %157 : vector<8x8xf32>
    %159 = vector.broadcast %155 : vector<8x1xf32> to vector<8x8xf32>
    %160 = arith.mulf %158, %159 : vector<8x8xf32>
    %c0_55 = arith.constant 0 : index
    %c24 = arith.constant 24 : index
    %161 = vector.load %arg5[%c0_55, %c24] : memref<8x32xf32, #tpu.memory_space<vmem>>, vector<8x8xf32>
    tpu.vector_store %arg5[%c0_55, %c24], %160 {strides = array<i32>} : memref<8x32xf32, #tpu.memory_space<vmem>>, vector<8x8xf32>,
    return
  }
  func.func @transform_0(%arg0: i32, %arg1: i32) -> (i32, i32) {
    %c0_i32 = arith.constant 0 : i32
    %c0_i32_0 = arith.constant 0 : i32
    %c0_i32_1 = arith.constant 0 : i32
    return %c0_i32, %c0_i32_0 : i32, i32
  }
  func.func @transform_1(%arg0: i32, %arg1: i32) -> (i32, i32) {
    %c0_i32 = arith.constant 0 : i32
    %c0_i32_0 = arith.constant 0 : i32
    %c0_i32_1 = arith.constant 0 : i32
    return %c0_i32, %c0_i32_0 : i32, i32
  }
  func.func @transform_2(%arg0: i32, %arg1: i32) -> (i32, i32) {
    %c1_i32 = arith.constant 1 : i32
    %0 = arith.muli %arg0, %c1_i32 : i32
    %1 = arith.addi %0, %arg1 : i32
    %c0_i32 = arith.constant 0 : i32
    %c0_i32_0 = arith.constant 0 : i32
    return %1, %c0_i32 : i32, i32
  }
  func.func @transform_3(%arg0: i32, %arg1: i32) -> (i32, i32) {
    %c1_i32 = arith.constant 1 : i32
    %0 = arith.muli %arg0, %c1_i32 : i32
    %1 = arith.addi %0, %arg1 : i32
    %c0_i32 = arith.constant 0 : i32
    %c0_i32_0 = arith.constant 0 : i32
    return %1, %c0_i32 : i32, i32
  }
}

module attributes {stable_mosaic.version = 11 : i64} {
  func.func @_matmul_kernel(%arg0: i32, %arg1: i32, %arg2: i32, %arg3: memref<16x32xf32, #tpu.memory_space<vmem>>, %arg4: memref<32x96xf32, #tpu.memory_space<vmem>>, %arg5: memref<16x96xf32, #tpu.memory_space<vmem>>, %arg6: memref<16x96xf32, #tpu.memory_space<vmem>>) attributes {dimension_semantics = [#tpu.dimension_semantics<parallel>, #tpu.dimension_semantics<parallel>, #tpu.dimension_semantics<arbitrary>], iteration_bounds = array<i64: 1, 1, 1>, scalar_prefetch = 0 : i64, scratch_operands = 1 : i64, tpu.core_type = #tpu.core_type<tc>, window_params = [{transform_indices = @transform_0, window_bounds = array<i64: 16, 32>}, {transform_indices = @transform_1, window_bounds = array<i64: 32, 96>}, {transform_indices = @transform_2, window_bounds = array<i64: 16, 96>}]} {
    %c0_i32 = arith.constant 0 : i32
    %0 = arith.cmpi eq, %arg2, %c0_i32 : i32
    %1 = arith.extui %0 : i1 to i32
    %c0_i32_0 = arith.constant 0 : i32
    %2 = arith.cmpi ne, %1, %c0_i32_0 : i32
    scf.if %2 {
      %cst_10 = arith.constant 0.000000e+00 : f32
      %12 = vector.broadcast %cst_10 : f32 to vector<16x96xf32>
      %c0_11 = arith.constant 0 : index
      %c0_12 = arith.constant 0 : index
      %13 = vector.load %arg6[%c0_11, %c0_12] : memref<16x96xf32, #tpu.memory_space<vmem>>, vector<16x96xf32>
      tpu.vector_store %arg6[%c0_11, %c0_12], %12 {strides = array<i32>} : memref<16x96xf32, #tpu.memory_space<vmem>>, vector<16x96xf32>,
    } else {
    }
    %c0 = arith.constant 0 : index
    %c0_1 = arith.constant 0 : index
    %3 = vector.load %arg6[%c0, %c0_1] : memref<16x96xf32, #tpu.memory_space<vmem>>, vector<16x96xf32>
    %c0_2 = arith.constant 0 : index
    %c0_3 = arith.constant 0 : index
    %4 = vector.load %arg3[%c0_2, %c0_3] : memref<16x32xf32, #tpu.memory_space<vmem>>, vector<16x32xf32>
    %c0_4 = arith.constant 0 : index
    %c0_5 = arith.constant 0 : index
    %5 = vector.load %arg4[%c0_4, %c0_5] : memref<32x96xf32, #tpu.memory_space<vmem>>, vector<32x96xf32>
    %cst = arith.constant dense<0.000000e+00> : vector<16x96xf32>
    %6 = tpu.matmul %4, %5, %cst {dimension_numbers = #tpu.dot_dimension_numbers<[1], [0], [0], [1], [0, 0, 1, 1], [], []>} : vector<16x32xf32>, vector<32x96xf32>, vector<16x96xf32> -> vector<16x96xf32>
    %7 = arith.addf %3, %6 : vector<16x96xf32>
    %c0_6 = arith.constant 0 : index
    %c0_7 = arith.constant 0 : index
    %8 = vector.load %arg6[%c0_6, %c0_7] : memref<16x96xf32, #tpu.memory_space<vmem>>, vector<16x96xf32>
    tpu.vector_store %arg6[%c0_6, %c0_7], %7 {strides = array<i32>} : memref<16x96xf32, #tpu.memory_space<vmem>>, vector<16x96xf32>,
    %c0_i32_8 = arith.constant 0 : i32
    %9 = arith.cmpi eq, %arg2, %c0_i32_8 : i32
    %10 = arith.extui %9 : i1 to i32
    %c0_i32_9 = arith.constant 0 : i32
    %11 = arith.cmpi ne, %10, %c0_i32_9 : i32
    scf.if %11 {
      %c0_10 = arith.constant 0 : index
      %c0_11 = arith.constant 0 : index
      %12 = vector.load %arg6[%c0_10, %c0_11] : memref<16x96xf32, #tpu.memory_space<vmem>>, vector<16x96xf32>
      %c0_12 = arith.constant 0 : index
      %c0_13 = arith.constant 0 : index
      %13 = vector.load %arg5[%c0_12, %c0_13] : memref<16x96xf32, #tpu.memory_space<vmem>>, vector<16x96xf32>
      tpu.vector_store %arg5[%c0_12, %c0_13], %12 {strides = array<i32>} : memref<16x96xf32, #tpu.memory_space<vmem>>, vector<16x96xf32>,
    } else {
    }
    return
  }
  func.func @transform_0(%arg0: i32, %arg1: i32, %arg2: i32) -> (i32, i32) {
    %c0_i32 = arith.constant 0 : i32
    return %arg0, %arg2 : i32, i32
  }
  func.func @transform_1(%arg0: i32, %arg1: i32, %arg2: i32) -> (i32, i32) {
    %c0_i32 = arith.constant 0 : i32
    return %arg2, %arg1 : i32, i32
  }
  func.func @transform_2(%arg0: i32, %arg1: i32, %arg2: i32) -> (i32, i32) {
    %c0_i32 = arith.constant 0 : i32
    return %arg0, %arg1 : i32, i32
  }
}

</mosaic_0001>

<bundles_post_ra>
// kernel: band_mha_forward.5
= control target key start
LH: loop header
LB: loop body
LE: loop exit
PB: predicated region body
PF: predicated region fallthrough
CT: control target
= control target key end

     0   :  { %vm16_vm0 = vcmask 261120   ;;  %v181_v3 = vmov 0.0   ;;  %s229_s0 = inlined_call_operand.vmem [shape: f32[16,32], index: 0, kind: input, shape index: {}]   ;;  %s230_s1 = inlined_call_operand.vmem [shape: f32[32,32], index: 1, kind: input, shape index: {}]   ;;  %s231_s2 = inlined_call_operand.hbm [shape: f32[16,32], index: 2, kind: output, shape index: {}]  }
   0x1   :  { %v26_v0 = vld [vmem:[%s230_s1 + $0x18] sm:$0xff]  ;;  %v25_v1 = vld [vmem:[%s230_s1 + $0x10] sm:$0xff]  ;;  %v21_v2 = vld [vmem:[%s229_s0] sm:$0xff]  ;;  %18 = vst.msk [vmem:[#allocation2 + $0x8] sm:$0xff] %vm16_vm0, %v181_v3 }
   0x2   :  { %144 = vmatprep.subr.mxu0 %v26_v0  ;;  %17 = vst.msk [vmem:[#allocation2] sm:$0xff] %vm16_vm0, %v181_v3  ;;  %v24_v4 = vld [vmem:[%s230_s1 + $0x8] sm:$0xff]  ;;  %152 = vmatprep.mubr.msk.f32.mxu0 %vm16_vm0, %v21_v2 }
   0x3   :  { %145 = vmatpush3.msra.mxu0 %v26_v0 }
   0x4   :  { %7 = vsyncpa [#allocation4], 0  ;;  %146 = vmatprep.subr.mxu0 %v25_v1  ;;  %v23_v5 = vld [vmem:[%s230_s1] sm:$0xff]  ;;  %v22_v6 = vld [vmem:[%s229_s0 + $0x8] sm:$0xff]  ;;  %s182_s1 = smov [#allocation3]  }
   0x5   :  { %147 = vmatpush3.msra.mxu0 %v25_v1  ;;  %s125_s21 = sshll.u32 %s182_s1, 4  ;;  %s126_s21 = int_to_ptr.vmem [resolvable:$true] %s125_s21 }
   0x6   :  { %148 = vmatprep.subr.mxu0 %v24_v4  ;;  %s159_s0 = scalar_lea.vmem %s126_s21, 256  ;;  %p164_p1 = scmp.lt.s32.totalorder %s126_s21, %s126_s21 }
   0x7   :  { %149 = vmatpush3.msra.mxu0 %v24_v4  ;;  %p160_p0 = scmp.ne.s32.totalorder %s126_s21, %s159_s0  ;;  %p165_p2 = scmp.lt.s32.totalorder %s159_s0, %s159_s0 }
   0x8   :  { %150 = vmatprep.subr.mxu0 %v23_v5  ;;  %v20_v7 = vld [vmem:[#allocation2 + $0x8] sm:$0xff] }
   0x9   :  { %151 = vmatpush3.msra.mxu0 %v23_v5  ;;  %v19_v9 = vld [vmem:[#allocation2] sm:$0xff]  ;;  %p166_p3 = por %p165_p2, %p164_p1 }
   0xa   :  { %153 = vmatmul.mubr.msk.f32.vlgmr.msra.gmra.mxu0 %vm16_vm0, %v22_v6 }
   0xb   :  { %p167_p4 = pnand %p166_p3, %p160_p0 }
  0xca   :  { %v154_v8 = vpop.f32.mrf.mxu0 }
  0xcb   :  { %v110_v10 = vadd.f32 %v154_v8, %v20_v7 }
  0xcc   :  { %v100_v11 = vpop.f32.mrf.mxu0 }
  0xcd   :  { %112 = vst.msk [vmem:[#allocation2 + $0x8] sm:$0xff] %vm16_vm0, %v110_v10  ;;  %v109_v12 = vadd.f32 %v100_v11, %v19_v9 }
  0xcf   :  { %111 = vst.msk [vmem:[#allocation2] sm:$0xff] %vm16_vm0, %v109_v12 }
  0xd4   :  { %v117_v13 = vld [vmem:[#allocation2 + $0x8] sm:$0xff] }
  0xd5   :  { %119 = vst.msk [vmem:[#allocation3 + $0x8] sm:$0xff] %vm16_vm0, %v117_v13 }
  0xd6   :  { %v116_v14 = vld [vmem:[#allocation2] sm:$0xff] }
  0xd7   :  { %118 = vst.msk [vmem:[#allocation3] sm:$0xff] %vm16_vm0, %v116_v14 }
  0xd8   :  { %170 = shalt.err (!%p167_p4)
}
  0xd9   :  { %s183_s22 = smov 128   ;;  %s184_s23 = smov 8  }
  0xda   :  { %131 = dma.vmem_to_hbm [thread:$0]  %s126_s21, 256, %s231_s2, [#allocation4], %s183_s22, %s183_s22, %s184_s23  }
  0xdb   :  { %179 = dma.done.wait [#allocation4], 256  }
  0xdc   :  { %180 = vsyncadd [#allocation4], 4294967040 }
  0xdd   :  { %135 = vsyncpa [#allocation4], 1 }

// kernel: band_mha_forward.3
= control target key start
LH: loop header
LB: loop body
LE: loop exit
PB: predicated region body
PF: predicated region fallthrough
CT: control target
= control target key end

     0   :  { %7 = vsyncpa [#allocation4], 0  ;;  %s262_s0 = inlined_call_operand.hbm [shape: f32[16,32], index: 0, kind: input, shape index: {}]   ;;  %s263_s1 = inlined_call_operand.hbm [shape: f32[32,96], index: 1, kind: input, shape index: {}]   ;;  %s264_s2 = inlined_call_operand.vmem [shape: f32[16,96], index: 2, kind: output, shape index: {}]  }
   0x1   :  { %8 = vsyncpa [#allocation6], 0  ;;  %s222_s9 = smov [#allocation3]  }
   0x2   :  { %s14_s10 = sshll.u32 %s222_s9, 4  ;;  %s15_s10 = int_to_ptr.vmem [resolvable:$true] %s14_s10 }
   0x3   :  { %s186_s11 = scalar_lea.vmem %s15_s10, 256  ;;  %p191_p1 = scmp.lt.s32.totalorder %s15_s10, %s15_s10 }
   0x4   :  { %p187_p0 = scmp.ne.s32.totalorder %s15_s10, %s186_s11  ;;  %p192_p2 = scmp.lt.s32.totalorder %s186_s11, %s186_s11 }
   0x6   :  { %p193_p3 = por %p192_p2, %p191_p1 }
   0x8   :  { %p194_p4 = pnand %p193_p3, %p187_p0 }
   0xa   :  { %197 = shalt.err (!%p194_p4)
}
   0xb   :  { %s223_s12 = smov 128   ;;  %s224_s13 = smov 8  }
   0xc   :  { %20 = dma.hbm_to_vmem [thread:$0]  %s262_s0, 256, %s15_s10, [#allocation4], %s223_s12, %s223_s12, %s224_s13  }
   0xd   :  { %s225_s16 = smov [#allocation5]  }
   0xe   :  { %s26_s17 = sshll.u32 %s225_s16, 4  ;;  %s27_s17 = int_to_ptr.vmem [resolvable:$true] %s26_s17 }
   0xf   :  { %s206_s18 = scalar_lea.vmem %s27_s17, 512  ;;  %p211_p6 = scmp.lt.s32.totalorder %s27_s17, %s27_s17 }
  0x10   :  { %p207_p5 = scmp.ne.s32.totalorder %s27_s17, %s206_s18  ;;  %p212_p7 = scmp.lt.s32.totalorder %s206_s18, %s206_s18 }
  0x12   :  { %p213_p8 = por %p212_p7, %p211_p6 }
  0x14   :  { %p214_p9 = pnand %p213_p8, %p207_p5 }
  0x16   :  { %217 = shalt.err (!%p214_p9)
}
  0x17   :  { %32 = dma.hbm_to_vmem [thread:$0]  %s263_s1, 512, %s27_s17, [#allocation6], %s223_s12, %s223_s12, %s224_s13  }
  0x18   :  { %218 = dma.done.wait [#allocation4], 256  }
  0x19   :  { %219 = vsyncadd [#allocation4], 4294967040 }
  0x1a   :  { %220 = dma.done.wait [#allocation6], 512  }
  0x1b   :  { %221 = vsyncadd [#allocation6], 4294966784  ;;  %vm43_vm0 = vcmask 785408   ;;  %v226_v0 = vmov 0.0   ;;  %vm54_vm1 = vcmask 261120   ;;  %v53_v1 = vld [vmem:[#allocation5 + $0x18] sm:$0xff] }
  0x1c   :  { %45 = vst.msk [vmem:[#allocation2 + $0x8] sm:$0xff] %vm43_vm0, %v226_v0  ;;  %44 = vst.msk [vmem:[#allocation2] sm:$0xff] %vm43_vm0, %v226_v0  ;;  %v52_v2 = vld [vmem:[#allocation5 + $0x10] sm:$0xff]  ;;  %162 = vmatprep.subr.mxu0 %v53_v1  ;;  %v51_v4 = vld [vmem:[#allocation5 + $0x8] sm:$0xff] }
  0x1d   :  { %v48_v3 = vld [vmem:[#allocation3] sm:$0xff]  ;;  %163 = vmatpush3.msra.mxu0 %v53_v1  ;;  %v50_v5 = vld [vmem:[#allocation5] sm:$0xff]  ;;  %v49_v6 = vld [vmem:[#allocation3 + $0x8] sm:$0xff] }
  0x1e   :  { %170 = vmatprep.mubr.msk.f32.mxu0 %vm54_vm1, %v48_v3  ;;  %164 = vmatprep.subr.mxu0 %v52_v2 }
  0x1f   :  { %165 = vmatpush3.msra.mxu0 %v52_v2 }
  0x20   :  { %166 = vmatprep.subr.mxu0 %v51_v4 }
  0x21   :  { %167 = vmatpush3.msra.mxu0 %v51_v4 }
  0x22   :  { %168 = vmatprep.subr.mxu0 %v50_v5 }
  0x23   :  { %169 = vmatpush3.msra.mxu0 %v50_v5  ;;  %v47_v7 = vld [vmem:[#allocation2 + $0x8] sm:$0xff]  ;;  %v46_v9 = vld [vmem:[#allocation2] sm:$0xff] }
  0x24   :  { %171 = vmatmul.mubr.msk.f32.vlgmr.msra.gmra.mxu0 %vm54_vm1, %v49_v6 }
  0xe4   :  { %v172_v8 = vpop.f32.mrf.mxu0 }
  0xe5   :  { %v137_v10 = vadd.f32 %v172_v8, %v47_v7 }
  0xe6   :  { %v127_v11 = vpop.f32.mrf.mxu0 }
  0xe7   :  { %140 = vst.msk [vmem:[#allocation2 + $0x8] sm:$0xff] %vm43_vm0, %v137_v10  ;;  %v136_v12 = vadd.f32 %v127_v11, %v46_v9 }
  0xe9   :  { %139 = vst.msk [vmem:[#allocation2] sm:$0xff] %vm43_vm0, %v136_v12 }
  0xee   :  { %v145_v13 = vld [vmem:[#allocation2 + $0x8] sm:$0xff] }
  0xef   :  { %147 = vst.msk [vmem:[%s264_s2 + $0x8] sm:$0xff] %vm43_vm0, %v145_v13 }
  0xf0   :  { %v144_v14 = vld [vmem:[#allocation2] sm:$0xff] }
  0xf1   :  { %146 = vst.msk [vmem:[%s264_s2] sm:$0xff] %vm43_vm0, %v144_v14 }
  0xf2   :  { %152 = vsyncpa [#allocation4], 1 }
  0xf3   :  { %153 = vsyncpa [#allocation6], 1 }

// kernel: band_mha_forward.4
= control target key start
LH: loop header
LB: loop body
LE: loop exit
PB: predicated region body
PF: predicated region fallthrough
CT: control target
= control target key end

     0   :  { %s1890_s12 = smov 0   ;;  %s1892_s13 = smov 0   ;;  %s2120_s0 = inlined_call_operand.vmem [shape: f32[3,32], index: 0, kind: input, shape index: {}]   ;;  %s2121_s1 = inlined_call_operand.vmem [shape: f32[3,32], index: 1, kind: input, shape index: {}]   ;;  %s2122_s2 = inlined_call_operand.vmem [shape: f32[16,96], index: 2, kind: input, shape index: {}]   ;;  %s2123_s3 = inlined_call_operand.vmem [shape: f32[16,32], index: 3, kind: output, shape index: {}]  }
   0x1   :  { %s1894_s14 = smov 0  }
   0x2 LB: > { %s25_s15 = sadd.s32 1, %s1848_s13  ;;  %p1621_p0 = scmp.ge.s32.totalorder %s1852_s14, 1  ;;  %s1852_s14 = sphi %s1894_s14, %s13_s14   ;;  %s1848_s13 = sphi %s1892_s13, %s2127_s13   ;;  %s1844_s12 = sphi %s1890_s12, %s2126_s12  }
   0x3   : > { %p27_p1 = scmp.ge.s32.totalorder %s25_s15, 2  ;;  %p154_p2 = scmp.lt.s32.totalorder %s1852_s14, 3 }
   0x5   : > { %s2129_s15 = smov (%p27_p1, %s25_s15), 0  ;;  %p155_p3 = pnand %p1621_p0, %p154_p2 }
   0x6   : > { %p179_p4 = scmp.lt.s32.totalorder (!%p155_p3), %s1844_s12, 1  ;;  %s1856_s22 = smov (!%p155_p3), 96  }
   0x7   : > { %158 = sbr.rel (%p155_p3) target bundleno = 1875 (0x753), region = 32  ;;  %s1857_s23 = smov (!%p155_p3), 64  }
   0x8   : > { %s1858_s24 = smov (!%p155_p3), 88   ;;  %s1859_s25 = smov (!%p155_p3), 120  }
   0x9   : > { %s1860_s28 = smov (!%p155_p3), 56   ;;  %s1861_s29 = smov (!%p155_p3), 112  }
   0xa   : > { %s1862_s30 = smov (!%p155_p3), 80   ;;  %s1863_s4 = smov (!%p155_p3), 48  }
   0xb   : > { %s1864_s5 = smov (!%p155_p3), 72   ;;  %s1865_s6 = smov (!%p155_p3), 104  }
   0xc   : > { %v194_v0 = vld [vmem:[%s2120_s0] sm:$0x7]  ;;  %vm195_vm0 = vcmask 256000   ;;  %v1854_v1 = vmov 0.0   ;;  %s2131_s12 = smov (!%p179_p4, %s1844_s12), 1  ;;  %vm1855_vm1 = vmmov 0   ;;  %v213_v6 = vlaneseq }
   0xd   : > { %1691 = vmatprep.subr.mxu1 %v1854_v1  ;;  %196 = vst.msk [vmem:[#allocation2] sm:$0x7] %vm195_vm0, %v194_v0  ;;  %1686 = vmatprep.subr.mxu0 %v1854_v1  ;;  %s1622_s18 = sshll.u32 %s2131_s12, 3  ;;  %vm222_vm2 = vcmask 64512   ;;  %vm207_vm3 = vcmask 261125   ;;  %vm376_vm5 = vcmask 23552  }
   0xe   : > { %1693 = vmatprep.mubr.msk.f32.mxu1 %vm1855_vm1, %v1854_v1  ;;  %1688 = vmatprep.mubr.msk.f32.mxu0 %vm1855_vm1, %v1854_v1  ;;  %s182_s21 = scalar_lea.vmem %s2122_s2, %s1622_s18  ;;  %v1948_v7 = vshrl.u32 %v213_v6, 7  ;;  %v1950_v8 = vand.u32 127, %v213_v6  ;;  %v197_v19 = vld [vmem:[%s2121_s1] sm:$0x7]  ;;  %vm398_vm9 = vcmask 1042432   ;;  %s1866_s7 = smov 40  }
   0xf   : > { %v1926_v2 = vld [vmem:[%s182_s21] sm:$0xff]  ;;  %198 = vst.msk [vmem:[#allocation3] sm:$0x7] %vm195_vm0, %v197_v19  ;;  %s1867_s8 = smov 8   ;;  %s1868_s9 = smov 16   ;;  %vm880_vm10 = vcmask 130112  }
  0x10   : > { %204 = vrot.lane.b32.xlu0 %v1926_v2, %s1856_s22  ;;  %v1932_v4 = vmul.f32 0.35355338, %v1926_v2  ;;  %vm221_vm4 = vcmp.ge.s32.totalorder %v1950_v8, %v1948_v7  ;;  %v217_v13 = vsub.s32 %v1948_v7, %v1950_v8  ;;  %s188_s16 = scalar_lea.vmem %s2123_s3, %s1622_s18  ;;  %vm1215_vm11 = vcmask 195712   ;;  %s1869_s12 = smov 24  }
  0x11   : > { %vm1550_vm12 = vcmask 261312  }
  0x12   : > { %vm218_vm6 = vcmp.ge.s32.totalorder %v217_v13, 0  ;;  %vm219_vm7 = vcmp.lt.s32.totalorder %v217_v13, 4 }
  0x13   : > { %vm1964_vm8 = vmand %vm218_vm6, %vm219_vm7 }
  0x14   : > { %v1929_v3 = vld [vmem:[#allocation2] sm:$0x7] }
  0x15   : > { %1692 = vmatpush3.xpose.msk.msra.mxu1 %vm222_vm2, %v1929_v3 }
  0x16   : > { %1701 = vmatprep.subr.mxu1 %v1854_v1  ;;  %v1975_v20 = vld [vmem:[#allocation3] sm:$0x7] }
  0x18   : > { %1694 = vmatmul.mubr.msk.f32.vlgmr.msra.gmra.mxu1 %vm222_vm2, %v1932_v4 }
  0x19   : > { %1703 = vmatprep.mubr.msk.f32.mxu1 %vm1855_vm1, %v1854_v1 }
  0x82   : > { %v205_v5 = vpop.permute.xlu0 %204 }
  0x83   : > { %208 = vst.msk [vmem:[#allocation2 - $0x5] sm:$0xe0] %vm207_vm3, %v205_v5  ;;  %1687 = vmatpush3.xpose.msk.msra.mxu0 %vm222_vm2, %v205_v5 }
  0x84   : > { %1696 = vmatprep.subr.mxu0 %v1854_v1 }
  0x86   : > { %1689 = vmatmul.mubr.msk.f32.vlgmr.msra.gmra.mxu0 %vm222_vm2, %v1932_v4 }
  0x87   : > { %1698 = vmatprep.mubr.msk.f32.mxu0 %vm1855_vm1, %v1854_v1  ;;  %1697 = vmatpush3.msk.msra.mxu0 %vm398_vm9, %v1975_v20 }
  0x88   : > { %1706 = vmatprep.subr.mxu0 %v1854_v1 }
  0xd8   : > { %v367_v9 = vpop.f32.mrf.mxu1 }
  0xd9   : > { %v372_v10 = vsel %vm221_vm4, %v367_v9, -1e+30 }
  0xda   : > { %v1695_v11 = vpop.f32.mrf.mxu1  ;;  %v377_v12 = vsel %vm376_vm5, %v372_v10, -inf }
  0xdb   : > { %378 = vmax.xlane.f32.xlu1 %v377_v12 }
  0xec   : > { %209 = vrot.lane.b32.xlu1 %v1926_v2, %s1857_s23 }
  0xf0   : > { %549 = vrot.lane.b32.xlu1 %v1926_v2, %s1858_s24 }
  0xf4   : > { %625 = vrot.lane.b32.xlu1 %v1929_v3, %s1859_s25 }
  0xf8   : > { %547 = vrot.lane.b32.xlu1 %v1932_v4, %s1859_s25 }
 0x146   : > { %v294_v15 = vpop.f32.mrf.mxu0 }
 0x147   : > { %v371_v16 = vsel %vm1964_vm8, %v294_v15, -1e+30 }
 0x148   : > { %v1690_v17 = vpop.f32.mrf.mxu0  ;;  %v373_v18 = vsel %vm222_vm2, %v371_v16, -inf }
 0x149   : > { %374 = vmax.xlane.f32.xlu0 %v373_v18 }
 0x15f   : > { %722 = vrot.lane.b32.xlu0 %v1975_v20, %s1859_s25 }
 0x163   : > { %799 = vrot.lane.b32.xlu0 %v1926_v2, %s1860_s28 }
 0x164   : > { %v379_v21 = vpop.xlane.xlu1 %378 }
 0x168   : > { %v210_v22 = vpop.permute.xlu1 %209 }
 0x169   : > { %212 = vst.msk [vmem:[#allocation3 - $0x5] sm:$0xe0] %vm207_vm3, %v210_v22  ;;  %1702 = vmatpush3.msra.mxu1 %v210_v22 }
 0x16a   : > { %1711 = vmatprep.subr.mxu1 %v1854_v1 }
 0x16c   : > { %v550_v29 = vpop.permute.xlu1 %549 }
 0x170   : > { %v626_v30 = vpop.permute.xlu1 %625 }
 0x174   : > { %v548_v33 = vpop.permute.xlu1 %547 }
 0x1d2   : > { %v375_v23 = vpop.xlane.xlu0 %374 }
 0x1d3   : > { %v380_v24 = vmax.f32 %v375_v23, %v379_v21 }
 0x1d5   : > { %v381_v25 = vsub.f32 %v371_v16, %v380_v24  ;;  %v384_v26 = vsub.f32 %v372_v10, %v380_v24 }
 0x1d6   : > { %v723_v34 = vpop.permute.xlu0 %722 }
 0x1d7   : > { %v382_v27 = vmul.f32 1.442695, %v381_v25  ;;  %v385_v28 = vmul.f32 1.442695, %v384_v26 }
 0x1d9   : > { %1806 = vpow2.f32 %v382_v27 }
 0x1da   : > { %1808 = vpow2.f32 %v385_v28  ;;  %v800_v35 = vpop.permute.xlu0 %799 }
 0x1e6   : > { %v1984_v31 = vpop.eup %1806 }
 0x1e7   : > { %v1986_v32 = vpop.eup %1808  ;;  %1704 = vmatmul.mubr.msk.f32.vlgmr.msra.gmra.mxu1 %vm222_vm2, %v1984_v31 }
 0x1e8   : > { %1699 = vmatmul.mubr.msk.f32.vlgmr.msra.gmra.mxu0 %vm376_vm5, %v1986_v32  ;;  %1712 = vmatpush3.xpose.msk.msra.mxu1 %vm222_vm2, %v626_v30 }
 0x1e9   : > { %1707 = vmatpush3.xpose.msk.msra.mxu0 %vm222_vm2, %v550_v29  ;;  %1708 = vmatprep.mubr.msk.f32.mxu0 %vm1855_vm1, %v1854_v1 }
 0x1ea   : > { %1713 = vmatprep.mubr.msk.f32.mxu1 %vm1855_vm1, %v1854_v1  ;;  %1716 = vmatprep.subr.mxu0 %v1854_v1 }
 0x1eb   : > { %1714 = vmatmul.mubr.msk.f32.vlgmr.msra.gmra.mxu1 %vm222_vm2, %v548_v33  ;;  %1721 = vmatprep.subr.mxu1 %v1854_v1 }
 0x1ec   : > { %1709 = vmatmul.mubr.msk.f32.vlgmr.msra.gmra.mxu0 %vm222_vm2, %v548_v33  ;;  %1723 = vmatprep.mubr.msk.f32.mxu1 %vm1855_vm1, %v1854_v1 }
 0x1ed   : > { %1718 = vmatprep.mubr.msk.f32.mxu0 %vm1855_vm1, %v1854_v1  ;;  %1717 = vmatpush3.msk.msra.mxu0 %vm398_vm9, %v723_v34 }
 0x1ee   : > { %1726 = vmatprep.subr.mxu0 %v1854_v1  ;;  %1722 = vmatpush3.msra.mxu1 %v800_v35 }
 0x1ef   : > { %1731 = vmatprep.subr.mxu1 %v1854_v1 }
 0x2a7   : > { %v541_v36 = vpop.f32.mrf.mxu1 }
 0x2a8   : > { %v468_v37 = vpop.f32.mrf.mxu0 }
 0x2a9   : > { %v2009_v38 = vadd.f32 %v541_v36, %v468_v37  ;;  %v1705_v39 = vpop.f32.mrf.mxu1 }
 0x2aa   : > { %v1700_v40 = vpop.f32.mrf.mxu0 }
 0x2ab   : > { %v695_v41 = vpop.f32.mrf.mxu1 }
 0x2ac   : > { %v621_v42 = vpop.f32.mrf.mxu0  ;;  %v700_v43 = vsel %vm221_vm4, %v695_v41, -1e+30 }
 0x2ad   : > { %v699_v44 = vsel %vm1964_vm8, %v621_v42, -1e+30  ;;  %v1715_v45 = vpop.f32.mrf.mxu1  ;;  %v704_v46 = vsel %vm376_vm5, %v700_v43, -inf }
 0x2ae   : > { %v1710_v47 = vpop.f32.mrf.mxu0  ;;  %705 = vmax.xlane.f32.xlu0 %v704_v46  ;;  %v701_v48 = vsel %vm222_vm2, %v699_v44, -inf }
 0x2af   : > { %702 = vmax.xlane.f32.xlu1 %v701_v48 }
 0x2c0   : > { %882 = vrot.lane.b32.xlu1 %v1932_v4, %s1861_s29 }
 0x2c4   : > { %884 = vrot.lane.b32.xlu0 %v1926_v2, %s1862_s30 }
 0x2c8   : > { %960 = vrot.lane.b32.xlu0 %v1929_v3, %s1861_s29 }
 0x2cc   : > { %1057 = vrot.lane.b32.xlu0 %v1975_v20, %s1861_s29 }
 0x337   : > { %v706_v49 = vpop.xlane.xlu0 %705 }
 0x338   : > { %v703_v50 = vpop.xlane.xlu1 %702 }
 0x339   : > { %v707_v51 = vmax.f32 %v703_v50, %v706_v49 }
 0x33b   : > { %v708_v52 = vsub.f32 %v699_v44, %v707_v51  ;;  %v711_v53 = vsub.f32 %v700_v43, %v707_v51  ;;  %v885_v56 = vpop.permute.xlu0 %884 }
 0x33c   : > { %v883_v60 = vpop.permute.xlu1 %882 }
 0x33d   : > { %v709_v54 = vmul.f32 1.442695, %v708_v52  ;;  %v712_v55 = vmul.f32 1.442695, %v711_v53 }
 0x33f   : > { %1810 = vpow2.f32 %v709_v54  ;;  %v961_v57 = vpop.permute.xlu0 %960 }
 0x340   : > { %1812 = vpow2.f32 %v712_v55 }
 0x343   : > { %v1058_v61 = vpop.permute.xlu0 %1057 }
 0x34c   : > { %v2022_v58 = vpop.eup %1810 }
 0x34d   : > { %v2024_v59 = vpop.eup %1812  ;;  %1724 = vmatmul.mubr.msk.f32.vlgmr.msra.gmra.mxu1 %vm222_vm2, %v2022_v58  ;;  %v714_v8 = vsel %vm222_vm2, %v2022_v58, 0.0  ;;  %v390_v58 = vsel %vm376_vm5, %v1986_v32, 0.0 }
 0x34e   : > { %1719 = vmatmul.mubr.msk.f32.vlgmr.msra.gmra.mxu0 %vm376_vm5, %v2024_v59  ;;  %1732 = vmatpush3.xpose.msk.msra.mxu1 %vm222_vm2, %v961_v57  ;;  %v717_v7 = vsel %vm376_vm5, %v2024_v59, 0.0  ;;  %v387_v57 = vsel %vm222_vm2, %v1984_v31, 0.0 }
 0x34f   : > { %1727 = vmatpush3.xpose.msk.msra.mxu0 %vm222_vm2, %v885_v56  ;;  %1728 = vmatprep.mubr.msk.f32.mxu0 %vm1855_vm1, %v1854_v1 }
 0x350   : > { %1733 = vmatprep.mubr.msk.f32.mxu1 %vm1855_vm1, %v1854_v1  ;;  %1736 = vmatprep.subr.mxu0 %v1854_v1 }
 0x351   : > { %1734 = vmatmul.mubr.msk.f32.vlgmr.msra.gmra.mxu1 %vm222_vm2, %v883_v60  ;;  %1741 = vmatprep.subr.mxu1 %v1854_v1 }
 0x352   : > { %1729 = vmatmul.mubr.msk.f32.vlgmr.msra.gmra.mxu0 %vm222_vm2, %v883_v60  ;;  %1743 = vmatprep.mubr.msk.f32.mxu1 %vm1855_vm1, %v1854_v1 }
 0x353   : > { %1738 = vmatprep.mubr.msk.f32.mxu0 %vm1855_vm1, %v1854_v1  ;;  %1737 = vmatpush3.msk.msra.mxu0 %vm398_vm9, %v1058_v61 }
 0x354   : > { %1746 = vmatprep.subr.mxu0 %v1854_v1 }
 0x40d   : > { %v871_v62 = vpop.f32.mrf.mxu1 }
 0x40e   : > { %v795_v63 = vpop.f32.mrf.mxu0 }
 0x40f   : > { %v2046_v0 = vadd.f32 %v871_v62, %v795_v63  ;;  %v1725_v5 = vpop.f32.mrf.mxu1 }
 0x410   : > { %v1720_v6 = vpop.f32.mrf.mxu0 }
 0x411   : > { %v1030_v9 = vpop.f32.mrf.mxu1 }
 0x412   : > { %v956_v10 = vpop.f32.mrf.mxu0  ;;  %v1035_v11 = vsel %vm221_vm4, %v1030_v9, -1e+30 }
 0x413   : > { %v1034_v12 = vsel %vm1964_vm8, %v956_v10, -1e+30  ;;  %v1735_v13 = vpop.f32.mrf.mxu1  ;;  %v1039_v15 = vsel %vm376_vm5, %v1035_v11, -inf }
 0x414   : > { %v1730_v16 = vpop.f32.mrf.mxu0  ;;  %1040 = vmax.xlane.f32.xlu1 %v1039_v15  ;;  %v1036_v17 = vsel %vm222_vm2, %v1034_v12, -inf }
 0x415   : > { %1037 = vmax.xlane.f32.xlu0 %v1036_v17 }
 0x425   : > { %1134 = vrot.lane.b32.xlu1 %v1926_v2, %s1863_s4 }
 0x42b   : > { %1219 = vrot.lane.b32.xlu0 %v1926_v2, %s1864_s5 }
 0x42f   : > { %1295 = vrot.lane.b32.xlu0 %v1929_v3, %s1865_s6 }
 0x433   : > { %1217 = vrot.lane.b32.xlu0 %v1932_v4, %s1865_s6 }
 0x49d   : > { %v1041_v18 = vpop.xlane.xlu1 %1040 }
 0x49e   : > { %v1038_v19 = vpop.xlane.xlu0 %1037 }
 0x49f   : > { %v1042_v21 = vmax.f32 %v1038_v19, %v1041_v18 }
 0x4a1   : > { %v1043_v22 = vsub.f32 %v1034_v12, %v1042_v21  ;;  %v1046_v23 = vsub.f32 %v1035_v11, %v1042_v21  ;;  %v1135_v24 = vpop.permute.xlu1 %1134 }
 0x4a2   : > { %1742 = vmatpush3.msra.mxu1 %v1135_v24  ;;  %v1220_v27 = vpop.permute.xlu0 %1219 }
 0x4a3   : > { %v1044_v25 = vmul.f32 1.442695, %v1043_v22  ;;  %v1047_v26 = vmul.f32 1.442695, %v1046_v23  ;;  %1751 = vmatprep.subr.mxu1 %v1854_v1 }
 0x4a5   : > { %1814 = vpow2.f32 %v1044_v25 }
 0x4a6   : > { %1816 = vpow2.f32 %v1047_v26  ;;  %v1296_v28 = vpop.permute.xlu0 %1295 }
 0x4aa   : > { %v1218_v4 = vpop.permute.xlu0 %1217 }
 0x4b2   : > { %v1815_v29 = vpop.eup %1814 }
 0x4b3   : > { %v1817_v3 = vpop.eup %1816  ;;  %1744 = vmatmul.mubr.msk.f32.vlgmr.msra.gmra.mxu1 %vm222_vm2, %v1815_v29  ;;  %v1049_v14 = vsel %vm222_vm2, %v1815_v29, 0.0 }
 0x4b4   : > { %1739 = vmatmul.mubr.msk.f32.vlgmr.msra.gmra.mxu0 %vm376_vm5, %v1817_v3  ;;  %1752 = vmatpush3.xpose.msk.msra.mxu1 %vm222_vm2, %v1296_v28  ;;  %v1052_v45 = vsel %vm376_vm5, %v1817_v3, 0.0 }
 0x4b5   : > { %1747 = vmatpush3.xpose.msk.msra.mxu0 %vm222_vm2, %v1220_v27  ;;  %1748 = vmatprep.mubr.msk.f32.mxu0 %vm1855_vm1, %v1854_v1 }
 0x4b6   : > { %1753 = vmatprep.mubr.msk.f32.mxu1 %vm1855_vm1, %v1854_v1  ;;  %1756 = vmatprep.subr.mxu0 %v1854_v1 }
 0x4b7   : > { %1754 = vmatmul.mubr.msk.f32.vlgmr.msra.gmra.mxu1 %vm222_vm2, %v1218_v4  ;;  %1761 = vmatprep.subr.mxu1 %v1854_v1 }
 0x4b8   : > { %1749 = vmatmul.mubr.msk.f32.vlgmr.msra.gmra.mxu0 %vm222_vm2, %v1218_v4  ;;  %1763 = vmatprep.mubr.msk.f32.mxu1 %vm1855_vm1, %v1854_v1 }
 0x4b9   : > { %1758 = vmatprep.mubr.msk.f32.mxu0 %vm1855_vm1, %v1854_v1 }
 0x573   : > { %v1206_v30 = vpop.f32.mrf.mxu1 }
 0x574   : > { %v1130_v33 = vpop.f32.mrf.mxu0 }
 0x575   : > { %v1207_v34 = vadd.f32 %v1206_v30, %v1130_v33  ;;  %v1745_v35 = vpop.f32.mrf.mxu1 }
 0x576   : > { %v1740_v36 = vpop.f32.mrf.mxu0 }
 0x577   : > { %v1365_v37 = vpop.f32.mrf.mxu1 }
 0x578   : > { %v1291_v39 = vpop.f32.mrf.mxu0  ;;  %v1370_v40 = vsel %vm221_vm4, %v1365_v37, -1e+30 }
 0x579   : > { %v1369_v41 = vsel %vm1964_vm8, %v1291_v39, -1e+30  ;;  %v1755_v42 = vpop.f32.mrf.mxu1  ;;  %v1374_v43 = vsel %vm376_vm5, %v1370_v40, -inf }
 0x57a   : > { %v1750_v44 = vpop.f32.mrf.mxu0  ;;  %1375 = vmax.xlane.f32.xlu1 %v1374_v43  ;;  %v1371_v1 = vsel %vm222_vm2, %v1369_v41, -inf }
 0x57b   : > { %1372 = vmax.xlane.f32.xlu0 %v1371_v1 }
 0x58b   : > { %1469 = vrot.lane.b32.xlu1 %v1926_v2, %s1866_s7 }
 0x591   : > { %1392 = vrot.lane.b32.xlu0 %v1975_v20, %s1865_s6 }
 0x5af   : > { %718 = vadd.xlane.f32.xlu1 %v717_v7 }
 0x5b0   : > { %715 = vadd.xlane.f32.xlu0 %v714_v8 }
 0x5b4   : > { %1050 = vadd.xlane.f32.xlu0 %v1049_v14 }
 0x5b8   : > { %1053 = vadd.xlane.f32.xlu0 %v1052_v45 }
 0x603   : > { %v1376_v46 = vpop.xlane.xlu1 %1375 }
 0x604   : > { %v1373_v47 = vpop.xlane.xlu0 %1372 }
 0x605   : > { %v1377_v2 = vmax.f32 %v1373_v47, %v1376_v46 }
 0x607   : > { %v1378_v48 = vsub.f32 %v1369_v41, %v1377_v2  ;;  %v1381_v49 = vsub.f32 %v1370_v40, %v1377_v2  ;;  %v1470_v20 = vpop.permute.xlu1 %1469 }
 0x608   : > { %v1393_v50 = vpop.permute.xlu0 %1392  ;;  %1762 = vmatpush3.msra.mxu1 %v1470_v20 }
 0x609   : > { %v1379_v51 = vmul.f32 1.442695, %v1378_v48  ;;  %v1382_v52 = vmul.f32 1.442695, %v1381_v49  ;;  %1757 = vmatpush3.msk.msra.mxu0 %vm398_vm9, %v1393_v50 }
 0x60b   : > { %1818 = vpow2.f32 %v1379_v51 }
 0x60c   : > { %1820 = vpow2.f32 %v1382_v52 }
 0x618   : > { %v1819_v53 = vpop.eup %1818 }
 0x619   : > { %v1821_v54 = vpop.eup %1820  ;;  %1764 = vmatmul.mubr.msk.f32.vlgmr.msra.gmra.mxu1 %vm222_vm2, %v1819_v53  ;;  %v1384_v55 = vsel %vm222_vm2, %v1819_v53, 0.0 }
 0x61a   : > { %1759 = vmatmul.mubr.msk.f32.vlgmr.msra.gmra.mxu0 %vm376_vm5, %v1821_v54  ;;  %v1387_v56 = vsel %vm376_vm5, %v1821_v54, 0.0  ;;  %1385 = vadd.xlane.f32.xlu1 %v1384_v55 }
 0x61b   : > { %1388 = vadd.xlane.f32.xlu0 %v1387_v56 }
 0x61e   : > { %388 = vadd.xlane.f32.xlu1 %v387_v57 }
 0x61f   : > { %391 = vadd.xlane.f32.xlu0 %v390_v58 }
 0x638   : > { %v719_v59 = vpop.xlane.xlu1 %718 }
 0x639   : > { %v716_v60 = vpop.xlane.xlu0 %715 }
 0x63a   : > { %v720_v61 = vadd.f32 %v719_v59, %v716_v60 }
 0x63c   : > { %1822 = vrcp.f32 %v720_v61 }
 0x63d   : > { %v1051_v62 = vpop.xlane.xlu0 %1050 }
 0x641   : > { %v1054_v63 = vpop.xlane.xlu0 %1053 }
 0x642   : > { %v1055_v5 = vadd.f32 %v1054_v63, %v1051_v62 }
 0x644   : > { %1824 = vrcp.f32 %v1055_v5 }
 0x649   : > { %v1823_v6 = vpop.eup %1822 }
 0x64a   : > { %v875_v9 = vmul.f32 %v1823_v6, %v2046_v0 }
 0x64c   : > { %877 = vrot.lane.b32.xlu1 %v875_v9, %s1867_s8 }
 0x651   : > { %v1825_v31 = vpop.eup %1824 }
 0x652   : > { %v1210_v10 = vmul.f32 %v1825_v31, %v1207_v34 }
 0x654   : > { %1212 = vrot.lane.b32.xlu0 %v1210_v10, %s1868_s9 }
 0x6a3   : > { %v1386_v32 = vpop.xlane.xlu1 %1385 }
 0x6a4   : > { %v1389_v11 = vpop.xlane.xlu0 %1388 }
 0x6a5   : > { %v1390_v19 = vadd.f32 %v1389_v11, %v1386_v32 }
 0x6a7   : > { %v389_v12 = vpop.xlane.xlu1 %388 }
 0x6a8   : > { %v392_v13 = vpop.xlane.xlu0 %391 }
 0x6a9   : > { %v393_v15 = vadd.f32 %v392_v13, %v389_v12 }
 0x6ab   : > { %1826 = vrcp.f32 %v393_v15 }
 0x6ac   : > { %1828 = vrcp.f32 %v1390_v19 }
 0x6b8   : > { %v1827_v16 = vpop.eup %1826 }
 0x6b9   : > { %v545_v0 = vmul.f32 %v1827_v16, %v2009_v38  ;;  %v1829_v25 = vpop.eup %1828 }
 0x6bb   : > { %546 = vst.msk [vmem:[%s188_s16] sm:$0xff] %vm222_vm2, %v545_v0 }
 0x6be   : > { %v878_v17 = vpop.permute.xlu1 %877 }
 0x6bf   : > { %881 = vst.msk [vmem:[%s188_s16] sm:$0xff] %vm880_vm10, %v878_v17 }
 0x6c6   : > { %v1213_v18 = vpop.permute.xlu0 %1212 }
 0x6c7   : > { %1216 = vst.msk [vmem:[%s188_s16] sm:$0xff] %vm1215_vm11, %v1213_v18 }
 0x6d9   : > { %v1541_v21 = vpop.f32.mrf.mxu1 }
 0x6da   : > { %v1465_v22 = vpop.f32.mrf.mxu0 }
 0x6db   : > { %v1542_v23 = vadd.f32 %v1541_v21, %v1465_v22  ;;  %v1765_v24 = vpop.f32.mrf.mxu1 }
 0x6dc   : > { %v1760_v26 = vpop.f32.mrf.mxu0 }
 0x6dd   : > { %v1545_v27 = vmul.f32 %v1829_v25, %v1542_v23 }
 0x6df   : > { %1547 = vrot.lane.b32.xlu1 %v1545_v27, %s1869_s12 }
 0x751   : > { %v1548_v38 = vpop.permute.xlu1 %1547 }
 0x752   : > { %1551 = vst.msk [vmem:[%s188_s16] sm:$0xff] %vm1550_vm12, %v1548_v38 }
 0x753 PF: > { %s13_s14 = sadd.s32 1, %s1852_s14   ;;  %s2126_s12 = smov %s1848_s13 }
 0x754   : > { %p10_p5 = scmp.ge.s32.totalorder %s13_s14, 4   ;;  %s2127_s13 = smov %s2129_s15 }
 0x756   :  { %12 = sbr.rel (!%p10_p5) target bundleno = 2 (0x2), region = 66 }

</bundles_post_ra>
